<compile_context>
chip_gen: v7x
topology: tpu7x:2x2x1
jax: 0.10.0
libtpu: 0.0.40
codegen_flags: <defaults>
</compile_context>

<pallas_src>
from functools import partial

import jax
import jax.numpy as jnp
import numpy as np
from jax.experimental import pallas as pl
from jax.experimental.pallas import tpu as pltpu


# --------------------------------------------------------------------------
# Kernel: one grid step == one batch element.
#   x_ref : (C,  S) activation (S = F*F, lane-dense)
#   g_ref : (Cg, 1) per-channel gamma   (Cg == 1 broadcasts over all channels)
#   b_ref : (Cg, S) per-channel beta    (Cg == 1 broadcasts over all channels)
#   o_ref : (C,  S)
# --------------------------------------------------------------------------
def _input_norm_kernel(x_ref, g_ref, b_ref, o_ref):
    o_ref[...] = x_ref[...] * g_ref[...] + b_ref[...]


def _input_norm_impl(x, gamma, beta, num_channel):
    """InputNorm forward via one pallas_call.

    x     : (B, C, F, F) float
    gamma : (num_channel,)
    beta  : (num_channel, F, F)
    """
    B, C, F1, F2 = x.shape
    assert F1 == F2, "InputNorm expects square num_feature x num_feature maps"
    if num_channel == 3:
        assert C == 3, "num_channel==3 branch requires a 3-channel input"
    S = F1 * F2
    Cg = num_channel

    # Layout only (views): flatten spatial onto the lane axis.
    x2 = x.reshape(B, C, S).astype(jnp.float32)
    g2 = gamma.reshape(Cg, 1).astype(jnp.float32)
    b2 = beta.reshape(Cg, S).astype(jnp.float32)

    out = pl.pallas_call(
        _input_norm_kernel,
        out_shape=jax.ShapeDtypeStruct((B, C, S), jnp.float32),
        grid=(B,),
        in_specs=[
            # per-image activation block (batch dim squeezed out)
            pl.BlockSpec((None, C, S), lambda b: (b, 0, 0)),
            # gamma / beta: constant index_map -> fetched once, VMEM-resident
            pl.BlockSpec((Cg, 1), lambda b: (0, 0)),
            pl.BlockSpec((Cg, S), lambda b: (0, 0)),
        ],
        out_specs=pl.BlockSpec((None, C, S), lambda b: (b, 0, 0)),
        compiler_params=pltpu.CompilerParams(
            dimension_semantics=("parallel",)),
    )(x2, g2, b2)

    return out.reshape(B, C, F1, F2)


input_norm_forward = jax.jit(_input_norm_impl, static_argnums=(3,))


# --------------------------------------------------------------------------
# Pure-JAX reference (mirrors the PyTorch forward exactly)
# --------------------------------------------------------------------------
def _reference_forward(x, gamma, beta, num_channel):
    if num_channel == 1:
        return gamma * x + beta
    if num_channel == 3:
        return jnp.einsum('...ijk,i->...ijk', x, gamma) + beta
    raise ValueError("unsupported num_channel")


# --------------------------------------------------------------------------
# Main
# --------------------------------------------------------------------------
if __name__ == "__main__":
    key = jax.random.PRNGKey(0)
    k_x, k_g1, k_b1, k_g3, k_b3 = jax.random.split(key, 5)

    B, C, F = 2, 3, 16
    x = jax.random.normal(k_x, (B, C, F, F), jnp.float32)

    # ---- num_channel == 1 branch: scalar gamma, beta (1, F, F) broadcast ----
    gamma1 = 1.0 + 0.1 * jax.random.normal(k_g1, (1,), jnp.float32)
    beta1 = 0.1 * jax.random.normal(k_b1, (1, F, F), jnp.float32)
    out1 = jax.block_until_ready(input_norm_forward(x, gamma1, beta1, 1))
    ref1 = _reference_forward(x, gamma1, beta1, 1)
    assert out1.shape == (B, C, F, F), out1.shape
    np.testing.assert_allclose(np.asarray(out1), np.asarray(ref1),
                               rtol=1e-6, atol=1e-6)

    # ---- num_channel == 3 branch: per-channel gamma, beta (3, F, F) ----
    gamma3 = 1.0 + 0.1 * jax.random.normal(k_g3, (3,), jnp.float32)
    beta3 = 0.1 * jax.random.normal(k_b3, (3, F, F), jnp.float32)
    out3 = jax.block_until_ready(input_norm_forward(x, gamma3, beta3, 3))
    ref3 = _reference_forward(x, gamma3, beta3, 3)
    assert out3.shape == (B, C, F, F), out3.shape
    np.testing.assert_allclose(np.asarray(out3), np.asarray(ref3),
                               rtol=1e-6, atol=1e-6)

    print("KERNEL_OK")
</pallas_src>

<mosaic_0001>
module attributes {stable_mosaic.version = 11 : i64} {
  func.func @_input_norm_kernel(%arg0: i32, %arg1: memref<1x3x256xf32, #tpu.memory_space<vmem>>, %arg2: memref<1x1xf32, #tpu.memory_space<vmem>>, %arg3: memref<1x256xf32, #tpu.memory_space<vmem>>, %arg4: memref<1x3x256xf32, #tpu.memory_space<vmem>>) attributes {dimension_semantics = [#tpu.dimension_semantics<parallel>], iteration_bounds = array<i64: 2>, scalar_prefetch = 0 : i64, scratch_operands = 0 : i64, tpu.core_type = #tpu.core_type<tc>, window_params = [{transform_indices = @transform_0, window_bounds = array<i64: 1, 3, 256>}, {pipeline_mode = #tpu.pipeline_mode<synchronous>, transform_indices = @transform_1, window_bounds = array<i64: 1, 1>}, {pipeline_mode = #tpu.pipeline_mode<synchronous>, transform_indices = @transform_2, window_bounds = array<i64: 1, 256>}, {transform_indices = @transform_3, window_bounds = array<i64: 1, 3, 256>}]} {
    %c0 = arith.constant 0 : index
    %c0_0 = arith.constant 0 : index
    %c0_1 = arith.constant 0 : index
    %0 = vector.load %arg1[%c0, %c0_0, %c0_1] : memref<1x3x256xf32, #tpu.memory_space<vmem>>, vector<1x3x256xf32>
    %1 = vector.shape_cast %0 : vector<1x3x256xf32> to vector<3x256xf32>
    %c0_2 = arith.constant 0 : index
    %c0_3 = arith.constant 0 : index
    %2 = vector.load %arg2[%c0_2, %c0_3] : memref<1x1xf32, #tpu.memory_space<vmem>>, vector<1x1xf32>
    %3 = vector.broadcast %2 : vector<1x1xf32> to vector<3x256xf32>
    %4 = arith.mulf %1, %3 : vector<3x256xf32>
    %c0_4 = arith.constant 0 : index
    %c0_5 = arith.constant 0 : index
    %5 = vector.load %arg3[%c0_4, %c0_5] : memref<1x256xf32, #tpu.memory_space<vmem>>, vector<1x256xf32>
    %6 = vector.broadcast %5 : vector<1x256xf32> to vector<3x256xf32>
    %7 = arith.addf %4, %6 : vector<3x256xf32>
    %c0_6 = arith.constant 0 : index
    %c0_7 = arith.constant 0 : index
    %c0_8 = arith.constant 0 : index
    %8 = vector.load %arg4[%c0_6, %c0_7, %c0_8] : memref<1x3x256xf32, #tpu.memory_space<vmem>>, vector<1x3x256xf32>
    %9 = vector.shape_cast %8 : vector<1x3x256xf32> to vector<3x256xf32>
    %10 = vector.shape_cast %7 : vector<3x256xf32> to vector<1x3x256xf32>
    tpu.vector_store %arg4[%c0_6, %c0_7, %c0_8], %10 {strides = array<i32>} : memref<1x3x256xf32, #tpu.memory_space<vmem>>, vector<1x3x256xf32>,
    return
  }
  func.func @transform_0(%arg0: i32) -> (i32, i32, i32) {
    %c0_i32 = arith.constant 0 : i32
    %c0_i32_0 = arith.constant 0 : i32
    %c0_i32_1 = arith.constant 0 : i32
    return %arg0, %c0_i32, %c0_i32_0 : i32, i32, i32
  }
  func.func @transform_1(%arg0: i32) -> (i32, i32) {
    %c0_i32 = arith.constant 0 : i32
    %c0_i32_0 = arith.constant 0 : i32
    %c0_i32_1 = arith.constant 0 : i32
    return %c0_i32, %c0_i32_0 : i32, i32
  }
  func.func @transform_2(%arg0: i32) -> (i32, i32) {
    %c0_i32 = arith.constant 0 : i32
    %c0_i32_0 = arith.constant 0 : i32
    %c0_i32_1 = arith.constant 0 : i32
    return %c0_i32, %c0_i32_0 : i32, i32
  }
  func.func @transform_3(%arg0: i32) -> (i32, i32, i32) {
    %c0_i32 = arith.constant 0 : i32
    %c0_i32_0 = arith.constant 0 : i32
    %c0_i32_1 = arith.constant 0 : i32
    return %arg0, %c0_i32, %c0_i32_0 : i32, i32, i32
  }
}

</mosaic_0001>

<bundles_post_ra>
// kernel: _input_norm_impl.1
= control target key start
LH: loop header
LB: loop body
LE: loop exit
PB: predicated region body
PF: predicated region fallthrough
CT: control target
= control target key end

     0   :  { %s310_s14 = smov 0   ;;  %s330_s0 = inlined_call_operand.vmem [shape: f32[2,3,256], index: 0, kind: input, shape index: {}]   ;;  %s331_s1 = inlined_call_operand.<no memory space> [shape: f32[1,1], index: 1, kind: input, shape index: {}]   ;;  %s332_s2 = inlined_call_operand.vmem [shape: f32[1,256], index: 2, kind: input, shape index: {}]   ;;  %s333_s3 = inlined_call_operand.vmem [shape: f32[2,3,256], index: 3, kind: output, shape index: {}]  }
   0x1   :  { %v8_v0 = vstv %s331_s1 }
   0x2   :  { %9 = vst [vmem:[#allocation2] sm:$0x1] %v8_v0 }
   0x3 LB: > { %s254_s15 = sadd.s32 4294967295, %s284_s14   ;;  %p258_p0 = scmp.ge.s32.totalorder %s284_s14, 1  ;;  %s284_s14 = sphi %s310_s14, %s15_s14  }
   0x4   : > { %p139_p1 = scmp.lt.s32.totalorder %s284_s14, 3 }
   0x6   : > { %p140_p2 = pnand %p258_p0, %p139_p1 }
   0x7   : > { %v286_v2 = vmov (!%p140_p2), 0   ;;  %v187_v3 = vlaneseq (!%p140_p2)  ;;  %p163_p3 = scmp.lt.s32.totalorder (!%p140_p2), %s254_s15, 1  ;;  %v185_v7 = vld [vmem:[%s332_s2] sm:$0x3] (!%p140_p2) }
   0x8   : > { %143 = sbr.rel (%p140_p2) target bundleno = 143 (0x8f), region = 32  ;;  %277 = vset.pattern.permute.xlu0 (!%p140_p2), %v286_v2 }
   0x9   : > { %v263_v1 = vld [vmem:[#allocation2] ss:$0 sm:$0xff] (!%p140_p2)  ;;  %v188_v4 = vshrl.u32 (!%p140_p2), %v187_v3, 7 }
   0xa   : > { %181 = vperm.xlu0 (!%p140_p2), %277, %v263_v1  }
   0xb   : > { %v189_v5 = vsub.s32 (!%p140_p2), 0, %v188_v4  ;;  %v193_v6 = vsub.s32 (!%p140_p2), 1, %v188_v4 }
   0xd   : > { %v190_v8 = vrot.slane (!%p140_p2), %v185_v7, %v189_v5  ;;  %v194_v9 = vrot.slane (!%p140_p2), %v185_v7, %v193_v6 }
   0xf   : > { %s335_s15 = smov (!%p163_p3, %s254_s15), 1  ;;  %v195_v11 = vcombine.low %v190_v8, %v194_v9 }
  0x10   : > { %s266_s17 = sshll.u32 %s335_s15, 3 }
  0x11   : > { %s167_s20 = scalar_lea.vmem %s330_s0, %s266_s17  ;;  %s172_s23 = scalar_lea.vmem %s333_s3, %s266_s17 }
  0x12   : > { %v173_v10 = vld [vmem:[%s167_s20] sm:$0x77] }
  0x89   : > { %v182_v12 = vpop.permute.xlu0 %181 }
  0x8a   : > { %v184_v13 = vmul.f32 %v182_v12, %v173_v10 }
  0x8c   : > { %v197_v14 = vadd.f32 %v195_v11, %v184_v13 }
  0x8e   : > { %198 = vst [vmem:[%s172_s23] sm:$0x77] %v197_v14 }
  0x8f PF: > { %s15_s14 = sadd.s32 1, %s284_s14  }
  0x90   : > { %p12_p4 = scmp.ge.s32.totalorder %s15_s14, 4  }
  0x92   :  { %14 = sbr.rel (!%p12_p4) target bundleno = 3 (0x3), region = 62 }

</bundles_post_ra>
